<compile_context>
chip_gen: v7x
topology: tpu7x:2x2x1
jax: 0.10.0
libtpu: 0.0.40
codegen_flags: <defaults>
</compile_context>

<pallas_src>
import jax
import jax.numpy as jnp
from jax.experimental import pallas as pl
from jax.experimental.pallas import tpu as pltpu


def _round_up(x: int, m: int) -> int:
    return ((x + m - 1) // m) * m


# --------------------------------------------------------------------------
# Kernel: one batch tile per grid step; weights/biases VMEM-resident.
# --------------------------------------------------------------------------
def _classifier_kernel(z_ref, w1_ref, b1_ref, w2_ref, b2_ref, out_ref):
    # Cast activations to bf16 in-kernel (VPU) — avoids a separate XLA cast
    # kernel and an extra HBM round-trip in the wrapper.
    z = z_ref[...].astype(jnp.bfloat16)
    # Hidden layer: h = relu(z @ W1 + b1); MXU matmul, f32 accumulation.
    h = jnp.dot(z, w1_ref[...], preferred_element_type=jnp.float32)
    h = jnp.maximum(h + b1_ref[...], 0.0)            # (TB, Hp) + (1, Hp), f32 epilogue
    # Output layer: logits = h @ W2 + b2 (hidden re-cast to bf16 for the MXU).
    logits = jnp.dot(h.astype(jnp.bfloat16), w2_ref[...],
                     preferred_element_type=jnp.float32)
    out_ref[...] = (logits + b2_ref[...]).astype(out_ref.dtype)


# --------------------------------------------------------------------------
# One-time parameter prep (call at init / after param updates, NOT per forward).
# --------------------------------------------------------------------------
def prepare_params(w1, b1, w2, b2):
    """Pad the hidden dim once and cast weights to bf16 (MXU-native).

    w1: (z_dim, hidden), b1: (hidden,) or (1, hidden)
    w2: (hidden, n_labels), b2: (n_labels,) or (1, n_labels)
    Returns (w1_p, b1_p, w2_p, b2_p) consumed by classifier_forward.
    """
    K, H = w1.shape
    L = w2.shape[1]
    # 256-aligned contraction for non-toy hidden sizes (v6e/v7x MXU is 2x256);
    # 128 alignment otherwise (v5e-native, avoids inflating tiny dims).
    Hp = _round_up(H, 256) if H >= 256 else _round_up(H, 128)

    w1_p = jnp.zeros((K, Hp), jnp.bfloat16).at[:, :H].set(w1.astype(jnp.bfloat16))
    b1_p = jnp.zeros((1, Hp), jnp.float32).at[:, :H].set(
        b1.reshape(1, -1).astype(jnp.float32))
    w2_p = jnp.zeros((Hp, L), jnp.bfloat16).at[:H, :].set(w2.astype(jnp.bfloat16))
    b2_p = b2.reshape(1, -1).astype(jnp.float32)
    # TODO(synk): on v7x, fp8 weight storage (with f32 accumulation) would halve
    # resident VMEM and double MXU throughput; kept bf16 for portability.
    return w1_p, b1_p, w2_p, b2_p


# --------------------------------------------------------------------------
# VMEM budgeting (hardware-aware cap + pipeline-buffer-aware estimate).
# --------------------------------------------------------------------------
def _vmem_cap_bytes() -> int:
    try:
        phys = int(pltpu.get_tpu_info().vmem_capacity_bytes)
    except Exception:
        phys = 64 * 1024 * 1024  # conservative (v7x-sized) fallback
    # Leave ~1/4 headroom for compiler-internal scratch:
    #   v7x (64 MiB phys) -> ~48 MiB cap; v5e/v6e (128 MiB) -> ~96 MiB cap.
    return (phys * 3) // 4


def _vmem_estimate(TB, K, Hp, L, weight_buffers) -> int:
    weights = ((K * Hp + Hp * L) * 2 + (Hp + L) * 4) * weight_buffers
    acts = 2 * TB * K * 4 + 2 * TB * L * 4              # double-buffered z / out tiles
    interm = TB * Hp * (4 + 2) + TB * K * 2             # f32 hidden + bf16 copies
    return weights + acts + interm


def _build_specs(TB, K, Hp, L, single_buffer_weights):
    if single_buffer_weights and hasattr(pl, "Buffered"):
        wkw = dict(pipeline_mode=pl.Buffered(1))         # constant index_map => 1 buffer
    else:
        wkw = {}
    in_specs = [
        pl.BlockSpec((TB, K), lambda i: (i, 0)),          # activation tile, pipelined
        pl.BlockSpec((K, Hp), lambda i: (0, 0), **wkw),   # W1 resident
        pl.BlockSpec((1, Hp), lambda i: (0, 0), **wkw),   # b1 resident
        pl.BlockSpec((Hp, L), lambda i: (0, 0), **wkw),   # W2 resident
        pl.BlockSpec((1, L), lambda i: (0, 0), **wkw),    # b2 resident
    ]
    out_spec = pl.BlockSpec((TB, L), lambda i: (i, 0))
    return in_specs, out_spec


# --------------------------------------------------------------------------
# Forward: logits = relu(z @ W1 + b1) @ W2 + b2
# --------------------------------------------------------------------------
def classifier_forward(z, params, *, batch_tile=512, out_dtype=None):
    """z: (B, z_dim) float32; params from prepare_params. Returns (B, n_labels)."""
    w1_p, b1_p, w2_p, b2_p = params
    B, K = z.shape
    Kw, Hp = w1_p.shape
    L = w2_p.shape[1]
    assert K == Kw, f"z feature dim {K} != W1 input dim {Kw}"
    out_dtype = out_dtype if out_dtype is not None else z.dtype

    # Batch tiling: TB multiple of 8 (sublane); only the batch dim is ever
    # padded in the hot path. Large batch_tile amortizes per-grid-step cost;
    # for B > batch_tile the grid has >= 2 steps so megacore can shard it.
    TB = _round_up(min(batch_tile, B), 8)
    Bp = _round_up(B, TB)
    z_in = z if Bp == B else jnp.zeros((Bp, K), z.dtype).at[:B].set(z)
    grid = (Bp // TB,)
    cap = _vmem_cap_bytes()

    out = None
    last_err = None
    for single_buf in (True, False):   # fall back to default buffering if needed
        in_specs, out_spec = _build_specs(TB, K, Hp, L, single_buf)
        wbuf = 1 if single_buf else 2
        vmem_limit = min(max(2 * _vmem_estimate(TB, K, Hp, L, wbuf),
                             32 * 1024 * 1024), cap)
        try:
            out = pl.pallas_call(
                _classifier_kernel,
                out_shape=jax.ShapeDtypeStruct((Bp, L), out_dtype),
                grid=grid,
                in_specs=in_specs,
                out_specs=out_spec,
                compiler_params=pltpu.CompilerParams(
                    dimension_semantics=("parallel",),   # megacore when grid >= 2
                    vmem_limit_bytes=vmem_limit,
                ),
            )(z_in, w1_p, b1_p, w2_p, b2_p)
            break
        except Exception as e:  # e.g. single-buffer pipeline_mode unsupported
            last_err = e
    if out is None:
        raise last_err

    return out if Bp == B else out[:B]


# --------------------------------------------------------------------------
# PyTorch-style init (Kaiming-uniform-ish), weights stored (in, out).
# --------------------------------------------------------------------------
def init_params(key, z_dim, hidden, n_labels):
    k1, k2, k3, k4 = jax.random.split(key, 4)
    bound1 = 1.0 / jnp.sqrt(z_dim)
    bound2 = 1.0 / jnp.sqrt(hidden)
    w1 = jax.random.uniform(k1, (z_dim, hidden), jnp.float32, -bound1, bound1)
    b1 = jax.random.uniform(k2, (1, hidden), jnp.float32, -bound1, bound1)
    w2 = jax.random.uniform(k3, (hidden, n_labels), jnp.float32, -bound2, bound2)
    b2 = jax.random.uniform(k4, (1, n_labels), jnp.float32, -bound2, bound2)
    return w1, b1, w2, b2


if __name__ == "__main__":
    # Small shapes implied by the module: z_dim -> classifier_hidden_size -> number_of_labels
    B, Z_DIM, HIDDEN, N_LABELS = 8, 32, 64, 10

    key = jax.random.PRNGKey(0)
    k_z, k_p = jax.random.split(key)
    z = jax.random.normal(k_z, (B, Z_DIM), jnp.float32)
    w1, b1, w2, b2 = init_params(k_p, Z_DIM, HIDDEN, N_LABELS)

    # One-time prep (padding + bf16 cast) — outside the per-call hot path.
    params = prepare_params(w1, b1, w2, b2)

    logits = classifier_forward(z, params)
    jax.block_until_ready(logits)
    assert logits.shape == (B, N_LABELS)
    assert logits.dtype == jnp.float32

    # Reference 1: same math with bf16 matmul inputs / f32 accumulation (tight check).
    zb, w1b, w2b = (a.astype(jnp.bfloat16) for a in (z, w1, w2))
    h_ref = jnp.maximum(
        jnp.dot(zb, w1b, preferred_element_type=jnp.float32) + b1, 0.0)
    ref_bf16 = jnp.dot(h_ref.astype(jnp.bfloat16), w2b,
                       preferred_element_type=jnp.float32) + b2
    assert jnp.allclose(logits, ref_bf16, atol=2e-2, rtol=2e-2)

    # Reference 2: full-f32 math (loose check — bf16 matmul inputs lose ~1e-2 rel).
    ref_f32 = jnp.maximum(z @ w1 + b1, 0.0) @ w2 + b2
    assert jnp.allclose(logits, ref_f32, atol=5e-2, rtol=5e-2)

    print("KERNEL_OK")
</pallas_src>

<mosaic_0001>
module attributes {stable_mosaic.version = 11 : i64} {
  func.func @_classifier_kernel(%arg0: i32, %arg1: memref<8x32xf32, #tpu.memory_space<vmem>>, %arg2: memref<32x128xbf16, #tpu.memory_space<vmem>>, %arg3: memref<1x128xf32, #tpu.memory_space<vmem>>, %arg4: memref<128x10xbf16, #tpu.memory_space<vmem>>, %arg5: memref<1x10xf32, #tpu.memory_space<vmem>>, %arg6: memref<8x10xf32, #tpu.memory_space<vmem>>) attributes {dimension_semantics = [#tpu.dimension_semantics<parallel>], iteration_bounds = array<i64: 1>, scalar_prefetch = 0 : i64, scratch_operands = 0 : i64, tpu.core_type = #tpu.core_type<tc>, window_params = [{transform_indices = @transform_0, window_bounds = array<i64: 8, 32>}, {pipeline_mode = #tpu.pipeline_mode<synchronous>, transform_indices = @transform_1, window_bounds = array<i64: 32, 128>}, {pipeline_mode = #tpu.pipeline_mode<synchronous>, transform_indices = @transform_2, window_bounds = array<i64: 1, 128>}, {pipeline_mode = #tpu.pipeline_mode<synchronous>, transform_indices = @transform_3, window_bounds = array<i64: 128, 10>}, {pipeline_mode = #tpu.pipeline_mode<synchronous>, transform_indices = @transform_4, window_bounds = array<i64: 1, 10>}, {transform_indices = @transform_5, window_bounds = array<i64: 8, 10>}]} {
    %c0 = arith.constant 0 : index
    %c0_0 = arith.constant 0 : index
    %0 = vector.load %arg1[%c0, %c0_0] : memref<8x32xf32, #tpu.memory_space<vmem>>, vector<8x32xf32>
    %1 = arith.truncf %0 : vector<8x32xf32> to vector<8x32xbf16>
    %c0_1 = arith.constant 0 : index
    %c0_2 = arith.constant 0 : index
    %2 = vector.load %arg2[%c0_1, %c0_2] : memref<32x128xbf16, #tpu.memory_space<vmem>>, vector<32x128xbf16>
    %cst = arith.constant dense<0.000000e+00> : vector<8x128xf32>
    %3 = tpu.matmul %1, %2, %cst {dimension_numbers = #tpu.dot_dimension_numbers<[1], [0], [0], [1], [0, 0, 1, 1], [], []>} : vector<8x32xbf16>, vector<32x128xbf16>, vector<8x128xf32> -> vector<8x128xf32>
    %c0_3 = arith.constant 0 : index
    %c0_4 = arith.constant 0 : index
    %4 = vector.load %arg3[%c0_3, %c0_4] : memref<1x128xf32, #tpu.memory_space<vmem>>, vector<1x128xf32>
    %5 = vector.broadcast %4 : vector<1x128xf32> to vector<8x128xf32>
    %6 = arith.addf %3, %5 : vector<8x128xf32>
    %cst_5 = arith.constant 0.000000e+00 : f32
    %7 = vector.broadcast %cst_5 : f32 to vector<8x128xf32>
    %8 = arith.maximumf %6, %7 : vector<8x128xf32>
    %9 = arith.truncf %8 : vector<8x128xf32> to vector<8x128xbf16>
    %c0_6 = arith.constant 0 : index
    %c0_7 = arith.constant 0 : index
    %10 = vector.load %arg4[%c0_6, %c0_7] : memref<128x10xbf16, #tpu.memory_space<vmem>>, vector<128x10xbf16>
    %cst_8 = arith.constant dense<0.000000e+00> : vector<8x10xf32>
    %11 = tpu.matmul %9, %10, %cst_8 {dimension_numbers = #tpu.dot_dimension_numbers<[1], [0], [0], [1], [0, 0, 1, 1], [], []>} : vector<8x128xbf16>, vector<128x10xbf16>, vector<8x10xf32> -> vector<8x10xf32>
    %c0_9 = arith.constant 0 : index
    %c0_10 = arith.constant 0 : index
    %12 = vector.load %arg5[%c0_9, %c0_10] : memref<1x10xf32, #tpu.memory_space<vmem>>, vector<1x10xf32>
    %13 = vector.broadcast %12 : vector<1x10xf32> to vector<8x10xf32>
    %14 = arith.addf %11, %13 : vector<8x10xf32>
    %c0_11 = arith.constant 0 : index
    %c0_12 = arith.constant 0 : index
    %15 = vector.load %arg6[%c0_11, %c0_12] : memref<8x10xf32, #tpu.memory_space<vmem>>, vector<8x10xf32>
    tpu.vector_store %arg6[%c0_11, %c0_12], %14 {strides = array<i32>} : memref<8x10xf32, #tpu.memory_space<vmem>>, vector<8x10xf32>,
    return
  }
  func.func @transform_0(%arg0: i32) -> (i32, i32) {
    %c0_i32 = arith.constant 0 : i32
    %c0_i32_0 = arith.constant 0 : i32
    return %arg0, %c0_i32 : i32, i32
  }
  func.func @transform_1(%arg0: i32) -> (i32, i32) {
    %c0_i32 = arith.constant 0 : i32
    %c0_i32_0 = arith.constant 0 : i32
    %c0_i32_1 = arith.constant 0 : i32
    return %c0_i32, %c0_i32_0 : i32, i32
  }
  func.func @transform_2(%arg0: i32) -> (i32, i32) {
    %c0_i32 = arith.constant 0 : i32
    %c0_i32_0 = arith.constant 0 : i32
    %c0_i32_1 = arith.constant 0 : i32
    return %c0_i32, %c0_i32_0 : i32, i32
  }
  func.func @transform_3(%arg0: i32) -> (i32, i32) {
    %c0_i32 = arith.constant 0 : i32
    %c0_i32_0 = arith.constant 0 : i32
    %c0_i32_1 = arith.constant 0 : i32
    return %c0_i32, %c0_i32_0 : i32, i32
  }
  func.func @transform_4(%arg0: i32) -> (i32, i32) {
    %c0_i32 = arith.constant 0 : i32
    %c0_i32_0 = arith.constant 0 : i32
    %c0_i32_1 = arith.constant 0 : i32
    return %c0_i32, %c0_i32_0 : i32, i32
  }
  func.func @transform_5(%arg0: i32) -> (i32, i32) {
    %c0_i32 = arith.constant 0 : i32
    %c0_i32_0 = arith.constant 0 : i32
    return %arg0, %c0_i32 : i32, i32
  }
}

module attributes {stable_mosaic.version = 11 : i64} {
  func.func @_classifier_kernel(%arg0: i32, %arg1: memref<8x32xf32, #tpu.memory_space<vmem>>, %arg2: memref<32x128xbf16, #tpu.memory_space<vmem>>, %arg3: memref<1x128xf32, #tpu.memory_space<vmem>>, %arg4: memref<128x10xbf16, #tpu.memory_space<vmem>>, %arg5: memref<1x10xf32, #tpu.memory_space<vmem>>, %arg6: memref<8x10xf32, #tpu.memory_space<vmem>>) attributes {dimension_semantics = [#tpu.dimension_semantics<parallel>], iteration_bounds = array<i64: 1>, scalar_prefetch = 0 : i64, scratch_operands = 0 : i64, tpu.core_type = #tpu.core_type<tc>, window_params = [{transform_indices = @transform_0, window_bounds = array<i64: 8, 32>}, {pipeline_mode = #tpu.pipeline_mode<synchronous>, transform_indices = @transform_1, window_bounds = array<i64: 32, 128>}, {pipeline_mode = #tpu.pipeline_mode<synchronous>, transform_indices = @transform_2, window_bounds = array<i64: 1, 128>}, {pipeline_mode = #tpu.pipeline_mode<synchronous>, transform_indices = @transform_3, window_bounds = array<i64: 128, 10>}, {pipeline_mode = #tpu.pipeline_mode<synchronous>, transform_indices = @transform_4, window_bounds = array<i64: 1, 10>}, {transform_indices = @transform_5, window_bounds = array<i64: 8, 10>}]} {
    %c0 = arith.constant 0 : index
    %c0_0 = arith.constant 0 : index
    %0 = vector.load %arg1[%c0, %c0_0] : memref<8x32xf32, #tpu.memory_space<vmem>>, vector<8x32xf32>
    %1 = arith.truncf %0 : vector<8x32xf32> to vector<8x32xbf16>
    %c0_1 = arith.constant 0 : index
    %c0_2 = arith.constant 0 : index
    %2 = vector.load %arg2[%c0_1, %c0_2] : memref<32x128xbf16, #tpu.memory_space<vmem>>, vector<32x128xbf16>
    %cst = arith.constant dense<0.000000e+00> : vector<8x128xf32>
    %3 = tpu.matmul %1, %2, %cst {dimension_numbers = #tpu.dot_dimension_numbers<[1], [0], [0], [1], [0, 0, 1, 1], [], []>} : vector<8x32xbf16>, vector<32x128xbf16>, vector<8x128xf32> -> vector<8x128xf32>
    %c0_3 = arith.constant 0 : index
    %c0_4 = arith.constant 0 : index
    %4 = vector.load %arg3[%c0_3, %c0_4] : memref<1x128xf32, #tpu.memory_space<vmem>>, vector<1x128xf32>
    %5 = vector.broadcast %4 : vector<1x128xf32> to vector<8x128xf32>
    %6 = arith.addf %3, %5 : vector<8x128xf32>
    %cst_5 = arith.constant 0.000000e+00 : f32
    %7 = vector.broadcast %cst_5 : f32 to vector<8x128xf32>
    %8 = arith.maximumf %6, %7 : vector<8x128xf32>
    %9 = arith.truncf %8 : vector<8x128xf32> to vector<8x128xbf16>
    %c0_6 = arith.constant 0 : index
    %c0_7 = arith.constant 0 : index
    %10 = vector.load %arg4[%c0_6, %c0_7] : memref<128x10xbf16, #tpu.memory_space<vmem>>, vector<128x10xbf16>
    %cst_8 = arith.constant dense<0.000000e+00> : vector<8x10xf32>
    %11 = tpu.matmul %9, %10, %cst_8 {dimension_numbers = #tpu.dot_dimension_numbers<[1], [0], [0], [1], [0, 0, 1, 1], [], []>} : vector<8x128xbf16>, vector<128x10xbf16>, vector<8x10xf32> -> vector<8x10xf32>
    %c0_9 = arith.constant 0 : index
    %c0_10 = arith.constant 0 : index
    %12 = vector.load %arg5[%c0_9, %c0_10] : memref<1x10xf32, #tpu.memory_space<vmem>>, vector<1x10xf32>
    %13 = vector.broadcast %12 : vector<1x10xf32> to vector<8x10xf32>
    %14 = arith.addf %11, %13 : vector<8x10xf32>
    %c0_11 = arith.constant 0 : index
    %c0_12 = arith.constant 0 : index
    %15 = vector.load %arg6[%c0_11, %c0_12] : memref<8x10xf32, #tpu.memory_space<vmem>>, vector<8x10xf32>
    tpu.vector_store %arg6[%c0_11, %c0_12], %14 {strides = array<i32>} : memref<8x10xf32, #tpu.memory_space<vmem>>, vector<8x10xf32>,
    return
  }
  func.func @transform_0(%arg0: i32) -> (i32, i32) {
    %c0_i32 = arith.constant 0 : i32
    %c0_i32_0 = arith.constant 0 : i32
    return %arg0, %c0_i32 : i32, i32
  }
  func.func @transform_1(%arg0: i32) -> (i32, i32) {
    %c0_i32 = arith.constant 0 : i32
    %c0_i32_0 = arith.constant 0 : i32
    %c0_i32_1 = arith.constant 0 : i32
    return %c0_i32, %c0_i32_0 : i32, i32
  }
  func.func @transform_2(%arg0: i32) -> (i32, i32) {
    %c0_i32 = arith.constant 0 : i32
    %c0_i32_0 = arith.constant 0 : i32
    %c0_i32_1 = arith.constant 0 : i32
    return %c0_i32, %c0_i32_0 : i32, i32
  }
  func.func @transform_3(%arg0: i32) -> (i32, i32) {
    %c0_i32 = arith.constant 0 : i32
    %c0_i32_0 = arith.constant 0 : i32
    %c0_i32_1 = arith.constant 0 : i32
    return %c0_i32, %c0_i32_0 : i32, i32
  }
  func.func @transform_4(%arg0: i32) -> (i32, i32) {
    %c0_i32 = arith.constant 0 : i32
    %c0_i32_0 = arith.constant 0 : i32
    %c0_i32_1 = arith.constant 0 : i32
    return %c0_i32, %c0_i32_0 : i32, i32
  }
  func.func @transform_5(%arg0: i32) -> (i32, i32) {
    %c0_i32 = arith.constant 0 : i32
    %c0_i32_0 = arith.constant 0 : i32
    return %arg0, %c0_i32 : i32, i32
  }
}

</mosaic_0001>

<bundles_post_ra>
// kernel: tpu_custom_call.1
= control target key start
LH: loop header
LB: loop body
LE: loop exit
PB: predicated region body
PF: predicated region fallthrough
CT: control target
= control target key end

     0   :  { %v310_v1 = vmov 0.0   ;;  %vm311_vm0 = vmmov 0   ;;  %vm47_vm1 = vcmask 261120   ;;  %s394_s0 = inlined_call_operand.vmem [shape: f32[8,32], index: 0, kind: input, shape index: {}]   ;;  %s395_s1 = inlined_call_operand.vmem [shape: bf16[32,128], index: 1, kind: input, shape index: {}]   ;;  %s396_s2 = inlined_call_operand.vmem [shape: f32[1,128], index: 2, kind: input, shape index: {}]   ;;  %s397_s3 = inlined_call_operand.vmem [shape: bf16[128,10], index: 3, kind: input, shape index: {}]   ;;  %s398_s4 = inlined_call_operand.vmem [shape: f32[1,10], index: 4, kind: input, shape index: {}]   ;;  %s399_s5 = inlined_call_operand.hbm [shape: f32[8,10], index: 5, kind: output, shape index: {}]  }
   0x1   :  { %v276_v0 = vld [vmem:[%s395_s1] sm:$0xff]   ;;  %245 = vmatprep.subr.bf16.mxu0 %v310_v1  ;;  %v277_v2 = vld [vmem:[%s395_s1 + $0x8] sm:$0xff]   ;;  %253 = vmatprep.subr.bf16.mxu1 %v310_v1  ;;  %v280_v7 = vld [vmem:[%s397_s3 + $0x10] sm:$0xff]  }
   0x2   :  { %246 = vmatpush3.bf16.msra.mxu0 %v276_v0  ;;  %249 = vmatprep.mubr.msk.bf16.mxu0 %vm311_vm0, %v310_v1  ;;  %v22_v3 = vld [vmem:[%s394_s0] sm:$0xff]  ;;  %v279_v6 = vld [vmem:[%s397_s3 + $0x8] sm:$0xff]  }
   0x3   :  { %247 = vmatprep.subr.bf16.mxu0 %v310_v1  ;;  %v278_v4 = vld [vmem:[%s397_s3] sm:$0xff]   ;;  %269 = vmatprep.mubr.msk.bf16.mxu1 %vm311_vm0, %v310_v1  ;;  %v23_v5 = vpack.c.bf16 %v22_v3, %v22_v3 }
   0x4   :  { %254 = vmatpush3.bf16.msra.mxu1 %v278_v4 }
   0x5   :  { %255 = vmatprep.subr.bf16.mxu1 %v310_v1 }
   0x6   :  { %248 = vmatpush3.bf16.msra.mxu0 %v277_v2 }
   0x8   :  { %256 = vmatpush3.bf16.msra.mxu1 %v279_v6 }
   0x9   :  { %250 = vmatmul.mubr.msk.bf16.vlgmr.msra.gmra.mrb[0].mxu0 %vm47_vm1, %v23_v5  ;;  %257 = vmatprep.subr.bf16.mxu1 %v310_v1 }
   0xa   :  { %10 = vsyncpa [#allocation3], 0  ;;  %v281_v8 = vld [vmem:[%s397_s3 + $0x18] sm:$0xff]   ;;  %v282_v9 = vld [vmem:[%s397_s3 + $0x20] sm:$0xff]   ;;  %s312_s17 = smov [#allocation2]   ;;  %vm204_vm2 = vcmask 80896  }
   0xb   :  { %v283_v10 = vld [vmem:[%s397_s3 + $0x28] sm:$0xff]   ;;  %v284_v11 = vld [vmem:[%s397_s3 + $0x30] sm:$0xff]   ;;  %v285_v12 = vld [vmem:[%s397_s3 + $0x38] sm:$0xff]   ;;  %s212_s18 = sshll.u32 %s312_s17, 4  ;;  %s213_s18 = int_to_ptr.vmem [resolvable:$true] %s212_s18 }
   0xc   :  { %258 = vmatpush3.bf16.msra.mxu1 %v280_v7  ;;  %v220_v13 = vld [vmem:[%s396_s2] ss:$0 sm:$0xff]  ;;  %s286_s2 = scalar_lea.vmem %s213_s18, 128  ;;  %p291_p1 = scmp.lt.s32.totalorder %s213_s18, %s213_s18 }
   0xd   :  { %259 = vmatprep.subr.bf16.mxu1 %v310_v1  ;;  %v224_v21 = vld [vmem:[%s398_s4] ss:$0 sm:$0xff]  ;;  %p287_p0 = scmp.ne.s32.totalorder %s213_s18, %s286_s2  ;;  %p292_p2 = scmp.lt.s32.totalorder %s286_s2, %s286_s2 }
   0xf   :  { %p293_p3 = por %p292_p2, %p291_p1 }
  0x10   :  { %260 = vmatpush3.bf16.msra.mxu1 %v281_v8 }
  0x11   :  { %261 = vmatprep.subr.bf16.mxu1 %v310_v1  ;;  %p294_p4 = pnand %p293_p3, %p287_p0 }
  0x14   :  { %262 = vmatpush3.bf16.msra.mxu1 %v282_v9 }
  0x15   :  { %263 = vmatprep.subr.bf16.mxu1 %v310_v1 }
  0x18   :  { %264 = vmatpush3.bf16.msra.mxu1 %v283_v10 }
  0x19   :  { %265 = vmatprep.subr.bf16.mxu1 %v310_v1 }
  0x1c   :  { %266 = vmatpush3.bf16.msra.mxu1 %v284_v11 }
  0x1d   :  { %267 = vmatprep.subr.bf16.mxu1 %v310_v1 }
  0x20   :  { %268 = vmatpush3.bf16.msra.mxu1 %v285_v12 }
  0xdc   :  { %v85_v14 = vpop.f32.mrb[0].mxu0 }
  0xdd   :  { %v86_v15 = vadd.f32 %v220_v13, %v85_v14  ;;  %v251_v16 = vpop.f32.mrb[1].mxu0 }
  0xde   :  { %v88_v17 = vpop.f32.mrb[2].mxu0 }
  0xdf   :  { %v91_v18 = vmax.f32 %v86_v15, 0.0  ;;  %v252_v19 = vpop.f32.mrb[3].mxu0 }
  0xe1   :  { %v92_v20 = vpack.c.bf16 %v91_v18, %v91_v18 }
  0xe3   :  { %270 = vmatmul.mubr.bf16.vlgmr.msra.gmra.mrb[0].mxu1 %v92_v20 }
 0x1b6   :  { %v198_v22 = vpop.f32.mrb[0].mxu1 }
 0x1b7   :  { %v199_v23 = vadd.f32 %v224_v21, %v198_v22  ;;  %v271_v24 = vpop.f32.mrb[1].mxu1 }
 0x1b8   :  { %v201_v25 = vpop.f32.mrb[2].mxu1 }
 0x1b9   :  { %v272_v26 = vpop.f32.mrb[3].mxu1  ;;  %205 = vst.msk [vmem:[#allocation2] sm:$0xff] %vm204_vm2, %v199_v23 }
 0x1ba   :  { %297 = shalt.err (!%p294_p4)
}
 0x1bb   :  { %s298_s4 = scalar_lea.hbm %s399_s5, 128 }
 0x1bc   :  { %p299_p5 = scmp.ne.s32.totalorder %s399_s5, %s298_s4  ;;  %p302_p6 = scmp.lt.u32.totalorder %s298_s4, %s399_s5 }
 0x1be   :  { %p304_p7 = pnand %p302_p6, %p299_p5 }
 0x1c0   :  { %307 = shalt.err (!%p304_p7)
}
 0x1c1   :  { %215 = dma.vmem_to_hbm [thread:$0]  %s213_s18, 128, %s399_s5, [#allocation3]  }
 0x1c2   :  { %308 = dma.done.wait [#allocation3], 128  }
 0x1c3   :  { %309 = vsyncadd [#allocation3], 4294967168 }
 0x1c4   :  { %219 = vsyncpa [#allocation3], 1 }

// kernel: tpu_custom_call.1
= control target key start
LH: loop header
LB: loop body
LE: loop exit
PB: predicated region body
PF: predicated region fallthrough
CT: control target
= control target key end

     0   :  { %v310_v1 = vmov 0.0   ;;  %vm311_vm0 = vmmov 0   ;;  %vm47_vm1 = vcmask 261120   ;;  %s394_s0 = inlined_call_operand.vmem [shape: f32[8,32], index: 0, kind: input, shape index: {}]   ;;  %s395_s1 = inlined_call_operand.vmem [shape: bf16[32,128], index: 1, kind: input, shape index: {}]   ;;  %s396_s2 = inlined_call_operand.vmem [shape: f32[1,128], index: 2, kind: input, shape index: {}]   ;;  %s397_s3 = inlined_call_operand.vmem [shape: bf16[128,10], index: 3, kind: input, shape index: {}]   ;;  %s398_s4 = inlined_call_operand.vmem [shape: f32[1,10], index: 4, kind: input, shape index: {}]   ;;  %s399_s5 = inlined_call_operand.hbm [shape: f32[8,10], index: 5, kind: output, shape index: {}]  }
   0x1   :  { %v276_v0 = vld [vmem:[%s395_s1] sm:$0xff]   ;;  %245 = vmatprep.subr.bf16.mxu0 %v310_v1  ;;  %v277_v2 = vld [vmem:[%s395_s1 + $0x8] sm:$0xff]   ;;  %253 = vmatprep.subr.bf16.mxu1 %v310_v1  ;;  %v280_v7 = vld [vmem:[%s397_s3 + $0x10] sm:$0xff]  }
   0x2   :  { %246 = vmatpush3.bf16.msra.mxu0 %v276_v0  ;;  %249 = vmatprep.mubr.msk.bf16.mxu0 %vm311_vm0, %v310_v1  ;;  %v22_v3 = vld [vmem:[%s394_s0] sm:$0xff]  ;;  %v279_v6 = vld [vmem:[%s397_s3 + $0x8] sm:$0xff]  }
   0x3   :  { %247 = vmatprep.subr.bf16.mxu0 %v310_v1  ;;  %v278_v4 = vld [vmem:[%s397_s3] sm:$0xff]   ;;  %269 = vmatprep.mubr.msk.bf16.mxu1 %vm311_vm0, %v310_v1  ;;  %v23_v5 = vpack.c.bf16 %v22_v3, %v22_v3 }
   0x4   :  { %254 = vmatpush3.bf16.msra.mxu1 %v278_v4 }
   0x5   :  { %255 = vmatprep.subr.bf16.mxu1 %v310_v1 }
   0x6   :  { %248 = vmatpush3.bf16.msra.mxu0 %v277_v2 }
   0x8   :  { %256 = vmatpush3.bf16.msra.mxu1 %v279_v6 }
   0x9   :  { %250 = vmatmul.mubr.msk.bf16.vlgmr.msra.gmra.mrb[0].mxu0 %vm47_vm1, %v23_v5  ;;  %257 = vmatprep.subr.bf16.mxu1 %v310_v1 }
   0xa   :  { %10 = vsyncpa [#allocation3], 0  ;;  %v281_v8 = vld [vmem:[%s397_s3 + $0x18] sm:$0xff]   ;;  %v282_v9 = vld [vmem:[%s397_s3 + $0x20] sm:$0xff]   ;;  %s312_s17 = smov [#allocation2]   ;;  %vm204_vm2 = vcmask 80896  }
   0xb   :  { %v283_v10 = vld [vmem:[%s397_s3 + $0x28] sm:$0xff]   ;;  %v284_v11 = vld [vmem:[%s397_s3 + $0x30] sm:$0xff]   ;;  %v285_v12 = vld [vmem:[%s397_s3 + $0x38] sm:$0xff]   ;;  %s212_s18 = sshll.u32 %s312_s17, 4  ;;  %s213_s18 = int_to_ptr.vmem [resolvable:$true] %s212_s18 }
   0xc   :  { %258 = vmatpush3.bf16.msra.mxu1 %v280_v7  ;;  %v220_v13 = vld [vmem:[%s396_s2] ss:$0 sm:$0xff]  ;;  %s286_s2 = scalar_lea.vmem %s213_s18, 128  ;;  %p291_p1 = scmp.lt.s32.totalorder %s213_s18, %s213_s18 }
   0xd   :  { %259 = vmatprep.subr.bf16.mxu1 %v310_v1  ;;  %v224_v21 = vld [vmem:[%s398_s4] ss:$0 sm:$0xff]  ;;  %p287_p0 = scmp.ne.s32.totalorder %s213_s18, %s286_s2  ;;  %p292_p2 = scmp.lt.s32.totalorder %s286_s2, %s286_s2 }
   0xf   :  { %p293_p3 = por %p292_p2, %p291_p1 }
  0x10   :  { %260 = vmatpush3.bf16.msra.mxu1 %v281_v8 }
  0x11   :  { %261 = vmatprep.subr.bf16.mxu1 %v310_v1  ;;  %p294_p4 = pnand %p293_p3, %p287_p0 }
  0x14   :  { %262 = vmatpush3.bf16.msra.mxu1 %v282_v9 }
  0x15   :  { %263 = vmatprep.subr.bf16.mxu1 %v310_v1 }
  0x18   :  { %264 = vmatpush3.bf16.msra.mxu1 %v283_v10 }
  0x19   :  { %265 = vmatprep.subr.bf16.mxu1 %v310_v1 }
  0x1c   :  { %266 = vmatpush3.bf16.msra.mxu1 %v284_v11 }
  0x1d   :  { %267 = vmatprep.subr.bf16.mxu1 %v310_v1 }
  0x20   :  { %268 = vmatpush3.bf16.msra.mxu1 %v285_v12 }
  0xdc   :  { %v85_v14 = vpop.f32.mrb[0].mxu0 }
  0xdd   :  { %v86_v15 = vadd.f32 %v220_v13, %v85_v14  ;;  %v251_v16 = vpop.f32.mrb[1].mxu0 }
  0xde   :  { %v88_v17 = vpop.f32.mrb[2].mxu0 }
  0xdf   :  { %v91_v18 = vmax.f32 %v86_v15, 0.0  ;;  %v252_v19 = vpop.f32.mrb[3].mxu0 }
  0xe1   :  { %v92_v20 = vpack.c.bf16 %v91_v18, %v91_v18 }
  0xe3   :  { %270 = vmatmul.mubr.bf16.vlgmr.msra.gmra.mrb[0].mxu1 %v92_v20 }
 0x1b6   :  { %v198_v22 = vpop.f32.mrb[0].mxu1 }
 0x1b7   :  { %v199_v23 = vadd.f32 %v224_v21, %v198_v22  ;;  %v271_v24 = vpop.f32.mrb[1].mxu1 }
 0x1b8   :  { %v201_v25 = vpop.f32.mrb[2].mxu1 }
 0x1b9   :  { %v272_v26 = vpop.f32.mrb[3].mxu1  ;;  %205 = vst.msk [vmem:[#allocation2] sm:$0xff] %vm204_vm2, %v199_v23 }
 0x1ba   :  { %297 = shalt.err (!%p294_p4)
}
 0x1bb   :  { %s298_s4 = scalar_lea.hbm %s399_s5, 128 }
 0x1bc   :  { %p299_p5 = scmp.ne.s32.totalorder %s399_s5, %s298_s4  ;;  %p302_p6 = scmp.lt.u32.totalorder %s298_s4, %s399_s5 }
 0x1be   :  { %p304_p7 = pnand %p302_p6, %p299_p5 }
 0x1c0   :  { %307 = shalt.err (!%p304_p7)
}
 0x1c1   :  { %215 = dma.vmem_to_hbm [thread:$0]  %s213_s18, 128, %s399_s5, [#allocation3]  }
 0x1c2   :  { %308 = dma.done.wait [#allocation3], 128  }
 0x1c3   :  { %309 = vsyncadd [#allocation3], 4294967168 }
 0x1c4   :  { %219 = vsyncpa [#allocation3], 1 }

</bundles_post_ra>
